<compile_context>
chip_gen: v7x
topology: tpu7x:2x2x1
jax: 0.10.0
libtpu: 0.0.40
codegen_flags: <defaults>
</compile_context>

<pallas_src>
import functools

import jax
import jax.numpy as jnp
import numpy as np
from jax.experimental import pallas as pl
from jax.experimental.pallas import tpu as pltpu


def _pick_tile(dim, cap, quantum):
    """Largest tile <= cap that divides dim and is a multiple of quantum.

    Falls back to the full dim (block == full array extent is always legal
    w.r.t. the (8,128) tiling rule)."""
    if dim <= cap:
        return dim
    t = (cap // quantum) * quantum
    while t >= quantum:
        if dim % t == 0:
            return t
        t -= quantum
    return dim


# ----------------------------------------------------------------------------
# Tiled linear kernel: out = x @ W + b
# ----------------------------------------------------------------------------
def _linear_kernel(x_ref, w_ref, b_ref, o_ref):
    acc = jnp.dot(x_ref[...], w_ref[...], preferred_element_type=jnp.float32)
    o_ref[...] = (acc + b_ref[...]).astype(o_ref.dtype)


def pallas_linear(x, w, b, *, out_dtype=jnp.float32, tm_cap=512, tn_cap=512):
    """x: (M, K) , w: (K, N), b: (N,) f32 -> (M, N) out_dtype.

    Grid over (M tiles, N tiles), both parallel; K kept whole per block
    (d_in of this module is small).
    """
    M, K = x.shape
    Kw, N = w.shape
    assert K == Kw
    tm = _pick_tile(M, tm_cap, 8)      # sublane axis: multiple of 8 (or full)
    tn = _pick_tile(N, tn_cap, 128)    # lane axis: multiple of 128 (or full)
    grid = (M // tm, N // tn)
    return pl.pallas_call(
        _linear_kernel,
        out_shape=jax.ShapeDtypeStruct((M, N), out_dtype),
        grid_spec=pltpu.PrefetchScalarGridSpec(
            num_scalar_prefetch=0,
            grid=grid,
            in_specs=[
                pl.BlockSpec((tm, K), lambda i, j: (i, 0)),
                pl.BlockSpec((K, tn), lambda i, j: (0, j)),
                pl.BlockSpec((1, tn), lambda i, j: (0, j)),
            ],
            out_specs=pl.BlockSpec((tm, tn), lambda i, j: (i, j)),
        ),
        compiler_params=pltpu.CompilerParams(
            dimension_semantics=("parallel", "parallel"),
            vmem_limit_bytes=64 * 1024 * 1024,
        ),
    )(x, w, b.reshape(1, N))


# ----------------------------------------------------------------------------
# Multi-head scaled-dot-product attention kernel.
# One grid step = (block of batch rows) x (block of query rows) x ALL heads.
# Heads stay packed in the last (lane) dim of q/k/v and of the context output.
# ----------------------------------------------------------------------------
def _mha_attention_kernel(q_ref, k_ref, v_ref, attn_ref, out_ref, *,
                          n_head, d_k, d_v, inv_scale):
    # q_ref   : (Bb, nq_blk, n_head*d_k)   bf16
    # k_ref   : (Bb, n_k,    n_head*d_k)   bf16
    # v_ref   : (Bb, n_k,    n_head*d_v)   bf16
    # attn_ref: (n_head, Bb, nq_blk, n_k)  f32
    # out_ref : (Bb, nq_blk, n_head*d_v)   bf16
    ctx_heads = []
    for h in range(n_head):                      # static, small head count
        q_h = q_ref[:, :, h * d_k:(h + 1) * d_k]
        k_h = k_ref[:, :, h * d_k:(h + 1) * d_k]
        v_h = v_ref[:, :, h * d_v:(h + 1) * d_v]

        # scores = (q @ k^T) * (1/scale)   — no transpose, no divide
        s = jnp.einsum("bqd,bkd->bqk", q_h, k_h,
                       preferred_element_type=jnp.float32) * inv_scale
        # TODO(synk): mask path (masked_fill with -inf) not implemented;
        # module is exercised with mask=None.

        # softmax over keys, f32, denominator via EUP reciprocal
        s_max = jnp.max(s, axis=-1, keepdims=True)
        e = jnp.exp(s - s_max)
        denom = jnp.sum(e, axis=-1, keepdims=True)
        attn = e * pl.reciprocal(denom, approx=True)

        attn_ref[h] = attn.astype(attn_ref.dtype)
        ctx_heads.append(
            jnp.einsum("bqk,bkd->bqd", attn.astype(v_h.dtype), v_h,
                       preferred_element_type=jnp.float32))

    # single lane-dense store: heads packed along the last dim (fc_o layout)
    out_ref[...] = jnp.concatenate(ctx_heads, axis=-1).astype(out_ref.dtype)


def pallas_mha_attention(qp, kp, vp, *, n_head, d_k, d_v, scale,
                         batch_cap=8, nq_cap=128):
    """qp: (batch, n_q, n_head*d_k), kp: (batch, n_k, n_head*d_k),
    vp: (batch, n_k, n_head*d_v)  (all bf16, heads packed in last dim).

    Returns:
      attn: (n_head, batch, n_q, n_k) f32
      ctx : (batch, n_q, n_head*d_v)  bf16
    """
    batch, n_q, _ = qp.shape
    _, n_k, _ = kp.shape

    Bb = _pick_tile(batch, batch_cap, 1)
    nq_blk = _pick_tile(n_q, nq_cap, 8)
    grid = (batch // Bb, n_q // nq_blk)

    kernel = functools.partial(_mha_attention_kernel, n_head=n_head,
                               d_k=d_k, d_v=d_v, inv_scale=1.0 / scale)

    attn, ctx = pl.pallas_call(
        kernel,
        out_shape=(
            jax.ShapeDtypeStruct((n_head, batch, n_q, n_k), jnp.float32),
            jax.ShapeDtypeStruct((batch, n_q, n_head * d_v), jnp.bfloat16),
        ),
        grid_spec=pltpu.PrefetchScalarGridSpec(
            num_scalar_prefetch=0,
            grid=grid,
            in_specs=[
                pl.BlockSpec((Bb, nq_blk, n_head * d_k),
                             lambda b, qi: (b, qi, 0)),
                pl.BlockSpec((Bb, n_k, n_head * d_k),
                             lambda b, qi: (b, 0, 0)),
                pl.BlockSpec((Bb, n_k, n_head * d_v),
                             lambda b, qi: (b, 0, 0)),
            ],
            out_specs=[
                pl.BlockSpec((n_head, Bb, nq_blk, n_k),
                             lambda b, qi: (0, b, qi, 0)),
                pl.BlockSpec((Bb, nq_blk, n_head * d_v),
                             lambda b, qi: (b, qi, 0)),
            ],
        ),
        compiler_params=pltpu.CompilerParams(
            dimension_semantics=("parallel", "parallel"),
            vmem_limit_bytes=64 * 1024 * 1024,
        ),
    )(qp, kp, vp)
    # TODO(synk): for very long n_k on v7x (64 MiB VMEM) add KV tiling; the
    # full attn matrix must be materialized anyway because the module returns
    # it, so only the per-step slab (bounded here by nq_blk/Bb) matters.
    return attn, ctx


# ----------------------------------------------------------------------------
# MultiHeadAttention forward (parameters passed explicitly)
# ----------------------------------------------------------------------------
def multi_head_attention(params, q, k, v):
    n_head = params["n_head"]
    d_k = params["d_k"]
    d_v = params["d_v"]

    batch, n_q, d_q_in = q.shape
    _, n_k, d_k_in = k.shape
    _, n_v, d_v_in = v.shape

    cdt = jnp.bfloat16  # MXU compute dtype; accumulation is f32 in-kernel.
    wq = params["Wq"].astype(cdt)
    wk = params["Wk"].astype(cdt)
    wv = params["Wv"].astype(cdt)
    wo = params["Wo"].astype(cdt)

    # Projections (fc_q / fc_k / fc_v), bf16 in / f32 accumulate / bf16 out.
    # TODO(synk): when q, k, v are the same tensor (self-attention) the three
    # weights can be concatenated into one lane-dense (d_in, 3*n_head*d_k)
    # matmul; with distinct q/k/v inputs they must stay separate.
    qp = pallas_linear(q.reshape(batch * n_q, d_q_in).astype(cdt),
                       wq, params["bq"], out_dtype=cdt)
    kp = pallas_linear(k.reshape(batch * n_k, d_k_in).astype(cdt),
                       wk, params["bk"], out_dtype=cdt)
    vp = pallas_linear(v.reshape(batch * n_v, d_v_in).astype(cdt),
                       wv, params["bv"], out_dtype=cdt)

    # No transposes: the attention kernel slices heads out of the packed last
    # dim and writes its context output directly in (batch, n_q, n_head*d_v).
    qp = qp.reshape(batch, n_q, n_head * d_k)
    kp = kp.reshape(batch, n_k, n_head * d_k)
    vp = vp.reshape(batch, n_v, n_head * d_v)

    scale = float(d_k) ** 0.5
    attn, ctx = pallas_mha_attention(qp, kp, vp, n_head=n_head, d_k=d_k,
                                     d_v=d_v, scale=scale)

    # (n_head, batch, n_q, n_k) -> (n_head*batch, n_q, n_k): free reshape,
    # same layout as the torch attn output.
    attn = attn.reshape(n_head * batch, n_q, n_k)

    # fc_o consumes the bf16 context slab directly.
    out = pallas_linear(ctx.reshape(batch * n_q, n_head * d_v),
                        wo, params["bo"], out_dtype=jnp.float32)
    out = out.reshape(batch, n_q, -1)
    return attn, out


def init_params(key, n_head, d_k_, d_v_, d_k, d_v, d_o):
    ks = jax.random.split(key, 8)
    scale = 0.02
    return {
        "n_head": n_head,
        "d_k": d_k,
        "d_v": d_v,
        # weights stored as (in, out), i.e. PyTorch W^T
        "Wq": jax.random.normal(ks[0], (d_k_, n_head * d_k), jnp.float32) * scale,
        "bq": jax.random.normal(ks[1], (n_head * d_k,), jnp.float32) * scale,
        "Wk": jax.random.normal(ks[2], (d_k_, n_head * d_k), jnp.float32) * scale,
        "bk": jax.random.normal(ks[3], (n_head * d_k,), jnp.float32) * scale,
        "Wv": jax.random.normal(ks[4], (d_v_, n_head * d_v), jnp.float32) * scale,
        "bv": jax.random.normal(ks[5], (n_head * d_v,), jnp.float32) * scale,
        "Wo": jax.random.normal(ks[6], (n_head * d_v, d_o), jnp.float32) * scale,
        "bo": jax.random.normal(ks[7], (d_o,), jnp.float32) * scale,
    }


def reference_mha(params, q, k, v):
    """Pure-JAX f32 reference of the PyTorch forward (mask=None)."""
    n_head, d_k, d_v = params["n_head"], params["d_k"], params["d_v"]
    batch, n_q, _ = q.shape
    _, n_k, _ = k.shape
    qp = q @ params["Wq"] + params["bq"]
    kp = k @ params["Wk"] + params["bk"]
    vp = v @ params["Wv"] + params["bv"]
    qh = jnp.transpose(qp.reshape(batch, n_q, n_head, d_k),
                       (2, 0, 1, 3)).reshape(-1, n_q, d_k)
    kh = jnp.transpose(kp.reshape(batch, n_k, n_head, d_k),
                       (2, 0, 1, 3)).reshape(-1, n_k, d_k)
    vh = jnp.transpose(vp.reshape(batch, n_k, n_head, d_v),
                       (2, 0, 1, 3)).reshape(-1, n_k, d_v)
    s = jnp.einsum("bqd,bkd->bqk", qh, kh) / (float(d_k) ** 0.5)
    attn = jax.nn.softmax(s, axis=-1)
    ctx = jnp.einsum("bqk,bkd->bqd", attn, vh)
    ctx = jnp.transpose(ctx.reshape(n_head, batch, n_q, d_v),
                        (1, 2, 0, 3)).reshape(batch, n_q, -1)
    out = ctx @ params["Wo"] + params["bo"]
    return attn, out


if __name__ == "__main__":
    # Small shapes.  NOTE: the PyTorch module's view() only works when
    # d_k_ == d_k and d_v_ == d_v, so we pick those.
    n_head, d_k, d_v, d_o = 2, 8, 8, 16
    d_k_, d_v_ = d_k, d_v
    batch, n_q, n_k = 2, 8, 8

    key = jax.random.PRNGKey(0)
    key_p, key_q, key_k, key_v = jax.random.split(key, 4)

    params = init_params(key_p, n_head, d_k_, d_v_, d_k, d_v, d_o)
    q = jax.random.normal(key_q, (batch, n_q, d_k_), jnp.float32)
    k = jax.random.normal(key_k, (batch, n_k, d_k_), jnp.float32)
    v = jax.random.normal(key_v, (batch, n_k, d_v_), jnp.float32)

    attn, out = multi_head_attention(params, q, k, v)
    jax.block_until_ready((attn, out))

    assert attn.shape == (n_head * batch, n_q, n_k)
    assert out.shape == (batch, n_q, d_o)

    # Loose-tolerance check vs. f32 reference (kernel uses bf16 matmuls and
    # an approx reciprocal in the softmax denominator).
    ref_attn, ref_out = reference_mha(params, q, k, v)
    np.testing.assert_allclose(np.asarray(attn), np.asarray(ref_attn),
                               rtol=2e-2, atol=2e-2)
    np.testing.assert_allclose(np.asarray(out), np.asarray(ref_out),
                               rtol=2e-2, atol=2e-2)

    print("KERNEL_OK")
</pallas_src>

<mosaic_0001>
module attributes {stable_mosaic.version = 11 : i64} {
  func.func @_linear_kernel(%arg0: i32, %arg1: i32, %arg2: memref<16x8xbf16, #tpu.memory_space<vmem>>, %arg3: memref<8x16xbf16, #tpu.memory_space<vmem>>, %arg4: memref<1x16xf32, #tpu.memory_space<vmem>>, %arg5: memref<16x16xbf16, #tpu.memory_space<vmem>>) attributes {dimension_semantics = [#tpu.dimension_semantics<parallel>, #tpu.dimension_semantics<parallel>], iteration_bounds = array<i64: 1, 1>, scalar_prefetch = 0 : i64, scratch_operands = 0 : i64, tpu.core_type = #tpu.core_type<tc>, window_params = [{transform_indices = @transform_0, window_bounds = array<i64: 16, 8>}, {transform_indices = @transform_1, window_bounds = array<i64: 8, 16>}, {transform_indices = @transform_2, window_bounds = array<i64: 1, 16>}, {transform_indices = @transform_3, window_bounds = array<i64: 16, 16>}]} {
    %c0 = arith.constant 0 : index
    %c0_0 = arith.constant 0 : index
    %0 = vector.load %arg2[%c0, %c0_0] : memref<16x8xbf16, #tpu.memory_space<vmem>>, vector<16x8xbf16>
    %c0_1 = arith.constant 0 : index
    %c0_2 = arith.constant 0 : index
    %1 = vector.load %arg3[%c0_1, %c0_2] : memref<8x16xbf16, #tpu.memory_space<vmem>>, vector<8x16xbf16>
    %cst = arith.constant dense<0.000000e+00> : vector<16x16xf32>
    %2 = tpu.matmul %0, %1, %cst {dimension_numbers = #tpu.dot_dimension_numbers<[1], [0], [0], [1], [0, 0, 1, 1], [], []>} : vector<16x8xbf16>, vector<8x16xbf16>, vector<16x16xf32> -> vector<16x16xf32>
    %c0_3 = arith.constant 0 : index
    %c0_4 = arith.constant 0 : index
    %3 = vector.load %arg4[%c0_3, %c0_4] : memref<1x16xf32, #tpu.memory_space<vmem>>, vector<1x16xf32>
    %4 = vector.broadcast %3 : vector<1x16xf32> to vector<16x16xf32>
    %5 = arith.addf %2, %4 : vector<16x16xf32>
    %6 = arith.truncf %5 : vector<16x16xf32> to vector<16x16xbf16>
    %c0_5 = arith.constant 0 : index
    %c0_6 = arith.constant 0 : index
    %7 = vector.load %arg5[%c0_5, %c0_6] : memref<16x16xbf16, #tpu.memory_space<vmem>>, vector<16x16xbf16>
    tpu.vector_store %arg5[%c0_5, %c0_6], %6 {strides = array<i32>} : memref<16x16xbf16, #tpu.memory_space<vmem>>, vector<16x16xbf16>,
    return
  }
  func.func @transform_0(%arg0: i32, %arg1: i32) -> (i32, i32) {
    %c0_i32 = arith.constant 0 : i32
    %c0_i32_0 = arith.constant 0 : i32
    return %arg0, %c0_i32 : i32, i32
  }
  func.func @transform_1(%arg0: i32, %arg1: i32) -> (i32, i32) {
    %c0_i32 = arith.constant 0 : i32
    %c0_i32_0 = arith.constant 0 : i32
    return %c0_i32, %arg1 : i32, i32
  }
  func.func @transform_2(%arg0: i32, %arg1: i32) -> (i32, i32) {
    %c0_i32 = arith.constant 0 : i32
    %c0_i32_0 = arith.constant 0 : i32
    return %c0_i32, %arg1 : i32, i32
  }
  func.func @transform_3(%arg0: i32, %arg1: i32) -> (i32, i32) {
    %c0_i32 = arith.constant 0 : i32
    return %arg0, %arg1 : i32, i32
  }
}

</mosaic_0001>

<bundles_post_ra>
// kernel: tpu_custom_call.1
= control target key start
LH: loop header
LB: loop body
LE: loop exit
PB: predicated region body
PF: predicated region fallthrough
CT: control target
= control target key end

     0   :  { %8 = vsyncpa [#allocation3], 0  ;;  %s353_s0 = inlined_call_operand.hbm [shape: bf16[16,8], index: 0, kind: input, shape index: {}]   ;;  %s354_s1 = inlined_call_operand.hbm [shape: bf16[8,16], index: 1, kind: input, shape index: {}]   ;;  %s355_s2 = inlined_call_operand.hbm [shape: f32[1,16], index: 2, kind: input, shape index: {}]   ;;  %s356_s3 = inlined_call_operand.hbm [shape: bf16[16,16], index: 3, kind: output, shape index: {}]  }
   0x1   :  { %9 = vsyncpa [#allocation6], 0 }
   0x2   :  { %10 = vsyncpa [#allocation4], 0  ;;  %s264_s12 = smov [#allocation5]   ;;  %s265_s14 = smov [#allocation2]  }
   0x3   :  { %s29_s13 = sshll.u32 %s264_s12, 4  ;;  %s16_s15 = sshll.u32 %s265_s14, 4  ;;  %s30_s13 = int_to_ptr.vmem [resolvable:$true] %s29_s13  ;;  %s292_s15 = int_to_ptr.vmem [resolvable:$true] %s16_s15 }
   0x4   :  { %s170_s18 = scalar_lea.hbm %s354_s1, 64 }
   0x5   :  { %p171_p0 = scmp.ne.s32.totalorder %s354_s1, %s170_s18  ;;  %p174_p1 = scmp.lt.u32.totalorder %s170_s18, %s354_s1 }
   0x7   :  { %p176_p2 = pnand %p174_p1, %p171_p0 }
   0x9   :  { %179 = shalt.err (!%p176_p2)
}
   0xa   :  { %s180_s23 = scalar_lea.vmem %s30_s13, 64  ;;  %p185_p4 = scmp.lt.s32.totalorder %s30_s13, %s30_s13 }
   0xb   :  { %p181_p3 = scmp.ne.s32.totalorder %s30_s13, %s180_s23  ;;  %p186_p5 = scmp.lt.s32.totalorder %s180_s23, %s180_s23 }
   0xd   :  { %p187_p6 = por %p186_p5, %p185_p4 }
   0xf   :  { %p188_p7 = pnand %p187_p6, %p181_p3 }
  0x11   :  { %191 = shalt.err (!%p188_p7)
}
  0x12   :  { %32 = dma.hbm_to_vmem [thread:$0]  %s354_s1, 64, %s30_s13, [#allocation6]  }
  0x13   :  { %s192_s28 = scalar_lea.hbm %s353_s0, 128 }
  0x14   :  { %p193_p8 = scmp.ne.s32.totalorder %s353_s0, %s192_s28  ;;  %p196_p9 = scmp.lt.u32.totalorder %s192_s28, %s353_s0 }
  0x16   :  { %p198_p10 = pnand %p196_p9, %p193_p8 }
  0x18   :  { %201 = shalt.err (!%p198_p10)
}
  0x19   :  { %s202_s6 = scalar_lea.vmem %s292_s15, 128  ;;  %p207_p12 = scmp.lt.s32.totalorder %s292_s15, %s292_s15 }
  0x1a   :  { %p203_p11 = scmp.ne.s32.totalorder %s292_s15, %s202_s6  ;;  %p208_p13 = scmp.lt.s32.totalorder %s202_s6, %s202_s6 }
  0x1c   :  { %p209_p0 = por %p208_p13, %p207_p12 }
  0x1e   :  { %p210_p1 = pnand %p209_p0, %p203_p11 }
  0x20   :  { %213 = shalt.err (!%p210_p1)
}
  0x21   :  { %s266_s1 = smov 64   ;;  %s267_s7 = smov 4  }
  0x22   :  { %22 = dma.hbm_to_vmem [thread:$0]  %s353_s0, 128, %s292_s15, [#allocation3], %s266_s1, %s266_s1, %s267_s7  }
  0x23   :  { %s268_s10 = smov [#allocation7]   ;;  %s214_s14 = scalar_lea.hbm %s355_s2, 16 }
  0x24   :  { %s39_s11 = sshll.u32 %s268_s10, 4  ;;  %p215_p2 = scmp.ne.s32.totalorder %s355_s2, %s214_s14  ;;  %s40_s11 = int_to_ptr.vmem [resolvable:$true] %s39_s11 }
  0x25   :  { %p218_p3 = scmp.lt.u32.totalorder %s214_s14, %s355_s2 }
  0x27   :  { %p220_p4 = pnand %p218_p3, %p215_p2 }
  0x29   :  { %223 = shalt.err (!%p220_p4)
}
  0x2a   :  { %s224_s20 = scalar_lea.vmem %s40_s11, 16  ;;  %s228_s0 = scalar_lea.vmem %s40_s11, 32 }
  0x2b   :  { %p225_p5 = scmp.ne.s32.totalorder %s40_s11, %s224_s20  ;;  %p229_p6 = scmp.lt.s32.totalorder %s40_s11, %s40_s11 }
  0x2c   :  { %p230_p7 = scmp.lt.s32.totalorder %s228_s0, %s224_s20 }
  0x2e   :  { %p231_p8 = por %p230_p7, %p229_p6 }
  0x30   :  { %p232_p9 = pnand %p231_p8, %p225_p5 }
  0x32   :  { %235 = shalt.err (!%p232_p9)
}
  0x33   :  { %42 = dma.hbm_to_vmem [thread:$0]  %s355_s2, 16, %s40_s11, [#allocation6]  }
  0x34   :  { %258 = dma.done.wait [#allocation3], 128  }
  0x35   :  { %259 = vsyncadd [#allocation3], 4294967168 }
  0x36   :  { %260 = dma.done.wait [#allocation6], 80  }
  0x37   :  { %261 = vsyncadd [#allocation6], 4294967216  ;;  %v269_v0 = vmov 0.0   ;;  %vm270_vm0 = vmmov 0   ;;  %vm72_vm1 = vcmask 1043456   ;;  %v169_v3 = vld [vmem:[#allocation2] sm:$0xff]  }
  0x38   :  { %155 = vmatprep.subr.bf16.mxu0 %v269_v0  ;;  %157 = vmatprep.mubr.msk.bf16.mxu0 %vm270_vm0, %v269_v0  ;;  %v55_v1 = vld [vmem:[#allocation5] sm:$0xf]  ;;  %vm68_vm2 = vcmask 64512   ;;  %v146_v4 = vld [vmem:[#allocation7] ss:$0 sm:$0xff]  ;;  %vm125_vm3 = vcmask 125952  }
  0x39   :  { %v74_v2 = vsel %vm72_vm1, %v55_v1, 0  ;;  %s271_s2 = smov [#allocation8]  }
  0x3a   :  { %156 = vmatpush3.bf16.msra.mxu0 %v74_v2  ;;  %s133_s22 = sshll.u32 %s271_s2, 4  ;;  %s134_s22 = int_to_ptr.vmem [resolvable:$true] %s133_s22 }
  0x3b   :  { %s236_s23 = scalar_lea.vmem %s134_s22, 128  ;;  %p241_p11 = scmp.lt.s32.totalorder %s134_s22, %s134_s22 }
  0x3c   :  { %p237_p10 = scmp.ne.s32.totalorder %s134_s22, %s236_s23  ;;  %p242_p12 = scmp.lt.s32.totalorder %s236_s23, %s236_s23 }
  0x3d   :  { %158 = vmatmul.mubr.msk.bf16.vlgmr.msra.gmra.mrb[0].mxu0 %vm68_vm2, %v169_v3 }
  0x3e   :  { %p243_p13 = por %p242_p12, %p241_p11 }
  0x40   :  { %p244_p0 = pnand %p243_p13, %p237_p10 }
 0x110   :  { %v110_v5 = vpop.f32.mrb[0].mxu0 }
 0x111   :  { %v111_v6 = vadd.f32 %v146_v4, %v110_v5  ;;  %v159_v7 = vpop.f32.mrb[1].mxu0 }
 0x112   :  { %v113_v8 = vpop.f32.mrb[2].mxu0 }
 0x113   :  { %v151_v9 = vpack.c.bf16 %v111_v6, %v111_v6  ;;  %v114_v10 = vadd.f32 %v146_v4, %v113_v8  ;;  %v160_v11 = vpop.f32.mrb[3].mxu0 }
 0x115   :  { %v152_v12 = vpack.c.bf16 %v114_v10, %v114_v10  ;;  %126 = vst.msk [vmem:[#allocation8] sm:$0xf] %vm125_vm3, %v151_v9 }
 0x117   :  { %127 = vst.msk [vmem:[#allocation8 + $0x4] sm:$0xf] %vm125_vm3, %v152_v12 }
 0x118   :  { %247 = shalt.err (!%p244_p0)
}
 0x119   :  { %s248_s26 = scalar_lea.hbm %s356_s3, 128 }
 0x11a   :  { %p249_p1 = scmp.ne.s32.totalorder %s356_s3, %s248_s26  ;;  %p252_p2 = scmp.lt.u32.totalorder %s248_s26, %s356_s3 }
 0x11c   :  { %p254_p3 = pnand %p252_p2, %p249_p1 }
 0x11e   :  { %257 = shalt.err (!%p254_p3)
}
 0x11f   :  { %139 = dma.vmem_to_hbm [thread:$0]  %s134_s22, 128, %s356_s3, [#allocation4], %s266_s1, %s266_s1, %s267_s7  }
 0x120   :  { %262 = dma.done.wait [#allocation4], 128  }
 0x121   :  { %263 = vsyncadd [#allocation4], 4294967168 }
 0x122   :  { %143 = vsyncpa [#allocation3], 1 }
 0x123   :  { %144 = vsyncpa [#allocation6], 1 }
 0x124   :  { %145 = vsyncpa [#allocation4], 1 }

</bundles_post_ra>
